<compile_context>
chip_gen: v5e
topology: v5e:2x2
jax: 0.10.0
libtpu: 0.0.40
codegen_flags: <defaults>
</compile_context>

<pallas_src>
import jax
import jax.numpy as jnp
from jax.experimental import pallas as pl
from jax.experimental.pallas import tpu as pltpu


def head_kernel(x_ref, w_ref, o_ref):
    TB, T, Ca = x_ref.shape          # Ca = C + 1 (ones column carries the bias)
    E = w_ref.shape[2]

    # Collapse (TB, T) -> rows; T == 8 is exactly one sublane tile, so this is
    # layout-trivial.
    x2d = x_ref[...].reshape(TB * T, Ca)

    # Three small MXU pushes (MXU has huge slack at this size).  Bias is the last
    # row of each weight; the sqrt(C) scale is already folded into w_ref[0].
    q = jnp.dot(x2d, w_ref[0], preferred_element_type=jnp.float32).reshape(TB, T, E)
    k = jnp.dot(x2d, w_ref[1], preferred_element_type=jnp.float32).reshape(TB, T, E)
    v = jnp.dot(x2d, w_ref[2], preferred_element_type=jnp.float32).reshape(TB, T, E)

    # Batched q @ k^T: contraction over the last dim of both operands
    # (no explicit .T -> no XLU transpose round trip).
    wei = jnp.einsum("bqe,bke->bqk", q, k, preferred_element_type=jnp.float32)

    # Numerically stable softmax over the last dim (exact reciprocal for parity).
    wei = wei - jnp.max(wei, axis=-1, keepdims=True)
    p = jnp.exp(wei)
    p = p * pl.reciprocal(jnp.sum(p, axis=-1, keepdims=True), approx=False)

    # Dropout: identity in eval mode.  No causal mask in the source module.
    out = jnp.einsum("bqk,bke->bqe", p, v, preferred_element_type=jnp.float32)

    # Lane-dense store: last dim T*E (128 at the reference shapes).
    o_ref[...] = out.reshape(TB, T * E).astype(o_ref.dtype)


def _select_batch_block(B, T, Ca, E, itemsize):
    """Device- and VMEM-aware batch block selection."""
    # Stay under the default scoped VMEM limit on every generation
    # (v7x has only 64 MiB physical / 32 MiB default scoped).
    try:
        info = pltpu.get_tpu_info()
        vmem = int(getattr(info, "vmem_capacity_bytes", 64 << 20))
    except Exception:  # pragma: no cover - conservative fallback
        vmem = 64 << 20
    budget = min(vmem // 2, 32 << 20)

    weight_bytes = 2 * 3 * Ca * E * itemsize            # double-buffered weights
    per_batch = 2 * (T * Ca + T * E) * itemsize         # double-buffered x + out blocks
    max_bb = max(8, (budget - weight_bytes) // per_batch)

    # Only v7x has 2 TensorCores; extra grid steps on single-TC chips (v5e/v6e)
    # just repeat the ~600-cycle per-step pipeline overhead.
    num_tc = 1
    try:
        kind = jax.devices()[0].device_kind.lower()
        if ("v7" in kind) or ("7x" in kind):
            num_tc = 2
    except Exception:  # pragma: no cover
        pass

    if B <= max_bb:
        bb = B
        # Megacore split only when each half's work exceeds the per-step overhead
        # and the lane-dense out block stays (8,128)-tileable.
        if (num_tc == 2 and B % 2 == 0 and (B // 2) % 8 == 0
                and (B // 2) * T >= 512):
            bb = B // 2
        return bb

    # Large B: tile the batch; keep blocks a multiple of 8 sublanes.
    return max(8, (max_bb // 8) * 8)


def head_forward(x, wq, bq, wk, bk, wv, bv, *, batch_block=None):
    """x: (B, T, C) float32.
    wq/wk/wv: (E, C) (PyTorch nn.Linear layout), bq/bk/bv: (E,).
    Returns (B, T, E)."""
    B, T, C = x.shape
    E = wq.shape[0]
    Ca = C + 1
    itemsize = jnp.dtype(x.dtype).itemsize

    # Fold the C**0.5 score scale (exactly as in the PyTorch source: MULTIPLY) into
    # the Q projection, and fold each bias in as an extra weight row fed by a
    # constant-1 column appended to x.
    scale = jnp.asarray(C ** 0.5, x.dtype)
    wq_a = jnp.concatenate([wq.T * scale, (bq * scale)[None, :]], axis=0)  # (Ca, E)
    wk_a = jnp.concatenate([wk.T, bk[None, :]], axis=0)                    # (Ca, E)
    wv_a = jnp.concatenate([wv.T, bv[None, :]], axis=0)                    # (Ca, E)
    w_all = jnp.stack([wq_a, wk_a, wv_a], axis=0)                          # (3, Ca, E)

    x_aug = jnp.concatenate([x, jnp.ones((B, T, 1), x.dtype)], axis=-1)    # (B, T, Ca)

    if batch_block is None:
        batch_block = _select_batch_block(B, T, Ca, E, itemsize)
    batch_block = int(batch_block)
    if batch_block < B and batch_block % 8 != 0:
        # Keep the (batch_block, T*E) out block sublane-tileable when tiling.
        batch_block = max(8, (batch_block // 8) * 8)

    # Pad the batch (padding beats many tiny grid steps); padded rows sliced off.
    n_steps = pl.cdiv(B, batch_block)
    B_pad = n_steps * batch_block
    if B_pad != B:
        x_aug = jnp.pad(x_aug, ((0, B_pad - B), (0, 0), (0, 0)))
    grid = (n_steps,)

    flops = 2 * B_pad * T * (3 * Ca * E + 2 * T * E)
    cost = pl.CostEstimate(
        flops=flops,
        transcendentals=B_pad * T * T,
        bytes_accessed=(B_pad * T * Ca + 3 * Ca * E + B_pad * T * E) * itemsize,
    )

    out = pl.pallas_call(
        head_kernel,
        out_shape=jax.ShapeDtypeStruct((B_pad, T * E), x.dtype),
        grid_spec=pltpu.PrefetchScalarGridSpec(
            num_scalar_prefetch=0,
            grid=grid,
            in_specs=[
                pl.BlockSpec((batch_block, T, Ca), lambda i: (i, 0, 0)),  # x (+ ones col)
                pl.BlockSpec((3, Ca, E), lambda i: (0, 0, 0)),            # fused W/bias
            ],
            out_specs=pl.BlockSpec((batch_block, T * E), lambda i: (i, 0)),
        ),
        compiler_params=pltpu.CompilerParams(
            dimension_semantics=("parallel",),
        ),
        cost_estimate=cost,
    )(x_aug, w_all)

    return out.reshape(B_pad, T, E)[:B]


def reference_head(x, wq, bq, wk, bk, wv, bv):
    """Pure-JAX reference matching the PyTorch module exactly (eval mode)."""
    q = x @ wq.T + bq
    k = x @ wk.T + bk
    v = x @ wv.T + bv
    C = x.shape[-1]
    wei = (q @ jnp.swapaxes(k, -2, -1)) * (C ** 0.5)
    wei = jax.nn.softmax(wei, axis=-1)
    return wei @ v


if __name__ == "__main__":
    # Shapes consistent with the module: x is (B, T, C); input_dim=C=32, embed_dim=E=16.
    B, T, C, E = 2, 8, 32, 16

    key = jax.random.PRNGKey(0)
    kx, kwq, kbq, kwk, kbk, kwv, kbv = jax.random.split(key, 7)

    x = jax.random.normal(kx, (B, T, C), dtype=jnp.float32)

    # torch nn.Linear-style init: weight (E, C), bias (E,), U(-1/sqrt(C), 1/sqrt(C))
    bound = 1.0 / (C ** 0.5)
    wq = jax.random.uniform(kwq, (E, C), jnp.float32, -bound, bound)
    bq = jax.random.uniform(kbq, (E,), jnp.float32, -bound, bound)
    wk = jax.random.uniform(kwk, (E, C), jnp.float32, -bound, bound)
    bk = jax.random.uniform(kbk, (E,), jnp.float32, -bound, bound)
    wv = jax.random.uniform(kwv, (E, C), jnp.float32, -bound, bound)
    bv = jax.random.uniform(kbv, (E,), jnp.float32, -bound, bound)

    out = head_forward(x, wq, bq, wk, bk, wv, bv)
    out = jax.block_until_ready(out)

    ref = reference_head(x, wq, bq, wk, bk, wv, bv)
    assert out.shape == (B, T, E)
    # Tolerance covers the scale/bias fold fp reassociation.
    assert jnp.allclose(out, ref, atol=2e-3, rtol=2e-3), "mismatch vs pure-JAX reference"

    print("KERNEL_OK")
</pallas_src>

<mosaic_0001>
module attributes {stable_mosaic.version = 11 : i64} {
  func.func @head_kernel(%arg0: i32, %arg1: memref<2x8x33xf32, #tpu.memory_space<vmem>>, %arg2: memref<3x33x16xf32, #tpu.memory_space<vmem>>, %arg3: memref<2x128xf32, #tpu.memory_space<vmem>>) attributes {dimension_semantics = [#tpu.dimension_semantics<parallel>], iteration_bounds = array<i64: 1>, scalar_prefetch = 0 : i64, scratch_operands = 0 : i64, tpu.core_type = #tpu.core_type<tc>, window_params = [{transform_indices = @transform_0, window_bounds = array<i64: 2, 8, 33>}, {pipeline_mode = #tpu.pipeline_mode<synchronous>, transform_indices = @transform_1, window_bounds = array<i64: 3, 33, 16>}, {transform_indices = @transform_2, window_bounds = array<i64: 2, 128>}]} {
    %c0 = arith.constant 0 : index
    %c0_0 = arith.constant 0 : index
    %c0_1 = arith.constant 0 : index
    %0 = vector.load %arg1[%c0, %c0_0, %c0_1] : memref<2x8x33xf32, #tpu.memory_space<vmem>>, vector<2x8x33xf32>
    %1 = vector.shape_cast %0 : vector<2x8x33xf32> to vector<16x33xf32>
    %c0_2 = arith.constant 0 : index
    %c0_3 = arith.constant 0 : index
    %c0_4 = arith.constant 0 : index
    %2 = vector.load %arg2[%c0_2, %c0_3, %c0_4] : memref<3x33x16xf32, #tpu.memory_space<vmem>>, vector<1x33x16xf32>
    %3 = vector.shape_cast %2 : vector<1x33x16xf32> to vector<33x16xf32>
    %cst = arith.constant dense<0.000000e+00> : vector<16x16xf32>
    %4 = tpu.matmul %1, %3, %cst {dimension_numbers = #tpu.dot_dimension_numbers<[1], [0], [0], [1], [0, 0, 1, 1], [], []>} : vector<16x33xf32>, vector<33x16xf32>, vector<16x16xf32> -> vector<16x16xf32>
    %5 = vector.shape_cast %4 : vector<16x16xf32> to vector<2x8x16xf32>
    %c1 = arith.constant 1 : index
    %c0_5 = arith.constant 0 : index
    %c0_6 = arith.constant 0 : index
    %6 = vector.load %arg2[%c1, %c0_5, %c0_6] : memref<3x33x16xf32, #tpu.memory_space<vmem>>, vector<1x33x16xf32>
    %7 = vector.shape_cast %6 : vector<1x33x16xf32> to vector<33x16xf32>
    %cst_7 = arith.constant dense<0.000000e+00> : vector<16x16xf32>
    %8 = tpu.matmul %1, %7, %cst_7 {dimension_numbers = #tpu.dot_dimension_numbers<[1], [0], [0], [1], [0, 0, 1, 1], [], []>} : vector<16x33xf32>, vector<33x16xf32>, vector<16x16xf32> -> vector<16x16xf32>
    %9 = vector.shape_cast %8 : vector<16x16xf32> to vector<2x8x16xf32>
    %c2 = arith.constant 2 : index
    %c0_8 = arith.constant 0 : index
    %c0_9 = arith.constant 0 : index
    %10 = vector.load %arg2[%c2, %c0_8, %c0_9] : memref<3x33x16xf32, #tpu.memory_space<vmem>>, vector<1x33x16xf32>
    %11 = vector.shape_cast %10 : vector<1x33x16xf32> to vector<33x16xf32>
    %cst_10 = arith.constant dense<0.000000e+00> : vector<16x16xf32>
    %12 = tpu.matmul %1, %11, %cst_10 {dimension_numbers = #tpu.dot_dimension_numbers<[1], [0], [0], [1], [0, 0, 1, 1], [], []>} : vector<16x33xf32>, vector<33x16xf32>, vector<16x16xf32> -> vector<16x16xf32>
    %13 = vector.shape_cast %12 : vector<16x16xf32> to vector<2x8x16xf32>
    "tpu.trace_start"() <{level = 10 : i32, message = "bqe,bke->bqk"}> : () -> ()
    %cst_11 = arith.constant dense<0.000000e+00> : vector<2x8x8xf32>
    %14 = tpu.matmul %5, %9, %cst_11 {dimension_numbers = #tpu.dot_dimension_numbers<[2], [2], [1], [1], [0, 0, 0, 1, 1, 1], [0], [0]>} : vector<2x8x16xf32>, vector<2x8x16xf32>, vector<2x8x8xf32> -> vector<2x8x8xf32>
    "tpu.trace_stop"() : () -> ()
    %cst_12 = arith.constant dense<0xFF800000> : vector<2x8xf32>
    %15 = vector.multi_reduction <maximumf>, %14, %cst_12 [2] : vector<2x8x8xf32> to vector<2x8xf32>
    %16 = vector.shape_cast %15 : vector<2x8xf32> to vector<2x8x1xf32>
    %17 = vector.broadcast %16 : vector<2x8x1xf32> to vector<2x8x8xf32>
    %18 = arith.subf %14, %17 : vector<2x8x8xf32>
    %19 = math.exp %18 : vector<2x8x8xf32>
    %cst_13 = arith.constant dense<0.000000e+00> : vector<2x8xf32>
    %20 = vector.multi_reduction <add>, %19, %cst_13 [2] : vector<2x8x8xf32> to vector<2x8xf32>
    %21 = vector.shape_cast %20 : vector<2x8xf32> to vector<2x8x1xf32>
    %22 = tpu.reciprocal %21 : vector<2x8x1xf32> -> vector<2x8x1xf32>
    %23 = vector.broadcast %22 : vector<2x8x1xf32> to vector<2x8x8xf32>
    %24 = arith.mulf %19, %23 : vector<2x8x8xf32>
    "tpu.trace_start"() <{level = 10 : i32, message = "bqk,bke->bqe"}> : () -> ()
    %cst_14 = arith.constant dense<0.000000e+00> : vector<2x8x16xf32>
    %25 = tpu.matmul %24, %13, %cst_14 {dimension_numbers = #tpu.dot_dimension_numbers<[2], [1], [1], [2], [0, 0, 0, 1, 1, 2], [0], [0]>} : vector<2x8x8xf32>, vector<2x8x16xf32>, vector<2x8x16xf32> -> vector<2x8x16xf32>
    "tpu.trace_stop"() : () -> ()
    %26 = vector.shape_cast %25 : vector<2x8x16xf32> to vector<2x128xf32>
    %c0_15 = arith.constant 0 : index
    %c0_16 = arith.constant 0 : index
    %27 = vector.load %arg3[%c0_15, %c0_16] : memref<2x128xf32, #tpu.memory_space<vmem>>, vector<2x128xf32>
    tpu.vector_store %arg3[%c0_15, %c0_16], %26 {strides = array<i32>} : memref<2x128xf32, #tpu.memory_space<vmem>>, vector<2x128xf32>,
    return
  }
  func.func @transform_0(%arg0: i32) -> (i32, i32, i32) {
    %c0_i32 = arith.constant 0 : i32
    %c0_i32_0 = arith.constant 0 : i32
    %c0_i32_1 = arith.constant 0 : i32
    return %arg0, %c0_i32, %c0_i32_0 : i32, i32, i32
  }
  func.func @transform_1(%arg0: i32) -> (i32, i32, i32) {
    %c0_i32 = arith.constant 0 : i32
    %c0_i32_0 = arith.constant 0 : i32
    %c0_i32_1 = arith.constant 0 : i32
    %c0_i32_2 = arith.constant 0 : i32
    return %c0_i32, %c0_i32_0, %c0_i32_1 : i32, i32, i32
  }
  func.func @transform_2(%arg0: i32) -> (i32, i32) {
    %c0_i32 = arith.constant 0 : i32
    %c0_i32_0 = arith.constant 0 : i32
    return %arg0, %c0_i32 : i32, i32
  }
}

</mosaic_0001>

<bundles_post_ra>
// kernel: tpu_custom_call.1
= control target key start
LH: loop header
LB: loop body
LE: loop exit
PB: predicated region body
PF: predicated region fallthrough
CT: control target
= control target key end

     0   :  { %vm26_vm0 = vcmask 1040384   ;;  %s554_s0 = inlined_call_operand.vmem [shape: f32[2,8,33], index: 0, kind: input, shape index: {}]   ;;  %s555_s1 = inlined_call_operand.vmem [shape: f32[3,33,16], index: 1, kind: input, shape index: {}]   ;;  %s556_s2 = inlined_call_operand.hbm [shape: f32[2,128], index: 2, kind: output, shape index: {}]  }
   0x1   :  { %v383_v0 = vld [vmem:[%s555_s1 + $0x48] sm:$0x1]  ;;  %v382_v1 = vld [vmem:[%s555_s1 + $0x40] sm:$0xff]  ;;  %v17_v3 = vld [vmem:[%s555_s1 + $0x18] sm:$0xff] }
   0x2   :  { %v18_v2 = vld [vmem:[%s555_s1 + $0x20] sm:$0x1]  ;;  %384 = vmatpush.msk.msra.mxu1 %vm26_vm0, %v383_v0  ;;  %v381_v4 = vld [vmem:[%s555_s1 + $0x38] sm:$0xff]  ;;  %v16_v5 = vld [vmem:[%s555_s1 + $0x10] sm:$0xff] }
   0x3   :  { %376 = vmatpush.msk.msra.mxu0 %vm26_vm0, %v18_v2  ;;  %v380_v6 = vld [vmem:[%s555_s1 + $0x30] sm:$0xff]  ;;  %v15_v7 = vld [vmem:[%s555_s1 + $0x8] sm:$0xff] }
   0x4   :  { %74 = vmatpush.msra.mxu1 %v382_v1 }
   0x5   :  { %42 = vmatpush.msra.mxu0 %v17_v3 }
   0x6   :  { %7 = vsyncpa [#allocation3], 0  ;;  %75 = vmatpush.msra.mxu1 %v381_v4  ;;  %v379_v8 = vld [vmem:[%s555_s1 + $0x28] sm:$0xff]  ;;  %v14_v9 = vld [vmem:[%s555_s1] sm:$0xff]  ;;  %vm19_vm1 = vcmask 269312   ;;  %vm117_vm2 = vcmask 130048  }
   0x7   :  { %43 = vmatpush.msra.mxu0 %v16_v5  ;;  %v12_v10 = vld [vmem:[%s554_s0] sm:$0xff]  ;;  %v13_v11 = vld [vmem:[%s554_s0 + $0x8] sm:$0xff]  ;;  %v391_v16 = vld [vmem:[%s555_s1 + $0x70] sm:$0x1]  ;;  %vm170_vm3 = vcmask 64512   ;;  %vm266_vm12 = vcmask 1047556  }
   0x8   :  { %76 = vmatpush.msra.mxu1 %v380_v6  ;;  %v390_v17 = vld [vmem:[%s555_s1 + $0x68] sm:$0xff]  ;;  %392 = vmatpush.msk.msra.mxu2 %vm26_vm0, %v391_v16  ;;  %v389_v18 = vld [vmem:[%s555_s1 + $0x60] sm:$0xff]  ;;  %v388_v23 = vld [vmem:[%s555_s1 + $0x58] sm:$0xff]  ;;  %v445_v61 = vmov 1983009808   ;;  %s448_s14 = smov 48  }
   0x9   :  { %44 = vmatpush.msra.mxu0 %v15_v7  ;;  %v387_v24 = vld [vmem:[%s555_s1 + $0x50] sm:$0xff]  ;;  %v269_v62 = vunpack.c.l.s4 %v445_v61  ;;  %v446_v0 = vmov 1934713408   ;;  %s447_s1 = smov 32   ;;  %s449_s15 = smov 64   ;;  %vm347_vm13 = vcmask 261120  }
   0xa   :  { %77 = vmatpush.msra.mxu1 %v379_v8  ;;  %106 = vmatpush.msra.mxu2 %v390_v17  ;;  %v291_v1 = vunpack.c.l.s4 %v446_v0  ;;  %s450_s16 = smov 16   ;;  %s451_s17 = smov 96   ;;  %vm349_vm14 = vcmask 392192   ;;  %vm351_vm15 = vcmask 523264   ;;  %vm353_vm0 = vcmask 654336  }
   0xb   :  { %45 = vmatpush.msra.mxu0 %v14_v9  ;;  %385 = vmatmul.msk.f32.vlgmr.msra.gmra.mxu1 %vm19_vm1, %v12_v10  ;;  %v270_v63 = vunpack.c.0.s8 %v269_v62  ;;  %s452_s18 = smov 80   ;;  %s453_s19 = smov 112  }
   0xc   :  { %377 = vmatmul.msk.f32.vlgmr.msra.gmra.mxu0 %vm19_vm1, %v12_v10  ;;  %107 = vmatpush.msra.mxu2 %v389_v18  ;;  %v292_v6 = vunpack.c.0.s8 %v291_v1  ;;  %s454_s20 = smov [#allocation2]   ;;  %s367_s24 = sshll.u32 %s556_s2, 4  ;;  %s368_s24 = int_to_ptr.hbm [resolvable:$true] %s367_s24 }
   0xd   :  { %s365_s21 = sshll.u32 %s454_s20, 4  ;;  %s366_s21 = int_to_ptr.vmem [resolvable:$true] %s365_s21 }
   0xe   :  { %108 = vmatpush.msra.mxu2 %v388_v23 }
  0x10   :  { %109 = vmatpush.msra.mxu2 %v387_v24 }
  0x11   :  { %393 = vmatmul.msk.f32.vlgmr.msra.gmra.mxu2 %vm19_vm1, %v12_v10 }
  0x13   :  { %386 = vmatmul.msk.f32.gmra.mxu1 %vm19_vm1, %v13_v11 }
  0x14   :  { %378 = vmatmul.msk.f32.gmra.mxu0 %vm19_vm1, %v13_v11 }
  0x19   :  { %394 = vmatmul.msk.f32.gmra.mxu2 %vm19_vm1, %v13_v11  ;;  %vm355_vm1 = vcmask 785408  }
  0x88   :  { %v79_v12 = vpop.f32.mrf.mxu1 }
  0x89   :  { %v47_v13 = vpop.f32.mrf.mxu0  ;;  %395 = vmatpush.xpose.msk.msra.mxu3 %vm117_vm2, %v79_v12 }
  0x8c   :  { %396 = vmatmul.msk.f32.vlgmr.msra.gmra.mxu3 %vm117_vm2, %v47_v13 }
  0x90   :  { %v82_v14 = vpop.f32.mrf.mxu1 }
  0x91   :  { %397 = vmatpush.xpose.msk.msrb.mxu3 %vm117_vm2, %v82_v14  ;;  %v50_v15 = vpop.f32.mrf.mxu0 }
  0x94   :  { %398 = vmatmul.msk.f32.vlgmr.msrb.gmra.mxu3 %vm117_vm2, %v50_v15  ;;  %v111_v35 = vpop.f32.mrf.mxu2 }
  0x95   :  { %237 = vmatpush.msra.mxu3 %v111_v35 }
  0x9c   :  { %v114_v36 = vpop.f32.mrf.mxu2 }
  0x9d   :  { %260 = vmatpush.msrb.mxu0 %v114_v36 }
 0x10f   :  { %v141_v19 = vpop.f32.mrf.mxu3 }
 0x110   :  { %v171_v20 = vsel %vm170_vm3, %v141_v19, -inf }
 0x111   :  { %172 = vmax.xlane.f32.xlu0 %v171_v20 }
 0x117   :  { %v167_v21 = vpop.f32.mrf.mxu3 }
 0x118   :  { %v174_v22 = vsel %vm170_vm3, %v167_v21, -inf }
 0x119   :  { %175 = vmax.xlane.f32.xlu0 %v174_v22 }
 0x184   :  { %v173_v25 = vpop.xlane.xlu0 %172 }
 0x185   :  { %v177_v26 = vsub.f32 %v141_v19, %v173_v25 }
 0x187   :  { %v179_v27 = vmul.f32 1.442695, %v177_v26 }
 0x189   :  { %411 = vpow2.f32 %v179_v27 }
 0x18c   :  { %v176_v28 = vpop.xlane.xlu0 %175 }
 0x18d   :  { %v178_v29 = vsub.f32 %v167_v21, %v176_v28 }
 0x18f   :  { %v412_v30 = vpop.eup %411  ;;  %v181_v31 = vmul.f32 1.442695, %v178_v29 }
 0x190   :  { %v183_v32 = vsel %vm170_vm3, %v412_v30, 0.0 }
 0x191   :  { %413 = vpow2.f32 %v181_v31  ;;  %184 = vadd.xlane.f32.xlu1 %v183_v32 }
 0x197   :  { %v414_v33 = vpop.eup %413 }
 0x198   :  { %v186_v34 = vsel %vm170_vm3, %v414_v33, 0.0 }
 0x199   :  { %187 = vadd.xlane.f32.xlu1 %v186_v34 }
 0x204   :  { %v185_v37 = vpop.xlane.xlu1 %184 }
 0x205   :  { %415 = vrcp.f32 %v185_v37  ;;  %v200_v42 = vand.u32 2147483648, %v185_v37  ;;  %v198_v44 = vand.u32 2147483647, %v185_v37  ;;  %vm194_vm5 = vweird.f32 %v185_v37 }
 0x207   :  { %v201_v47 = vor.u32 1.1754944e-38, %v200_v42  ;;  %vm199_vm7 = vcmp.eq.f32.partialorder %v198_v44, 8.507059e+37 }
 0x20b   :  { %v416_v38 = vpop.eup %415 }
 0x20c   :  { %v190_v39 = vmul.f32 %v416_v38, %v185_v37  ;;  %v188_v40 = vpop.xlane.xlu1 %187  ;;  %vm195_vm4 = vweird.f32 %v416_v38 }
 0x20d   :  { %417 = vrcp.f32 %v188_v40  ;;  %vm196_vm6 = vmor %vm194_vm5, %vm195_vm4  ;;  %v214_v53 = vand.u32 2147483648, %v188_v40  ;;  %v212_v55 = vand.u32 2147483647, %v188_v40  ;;  %vm208_vm9 = vweird.f32 %v188_v40 }
 0x20e   :  { %v191_v41 = vsub.f32 1.0, %v190_v39 }
 0x20f   :  { %v215_v57 = vor.u32 1.1754944e-38, %v214_v53  ;;  %vm213_vm11 = vcmp.eq.f32.partialorder %v212_v55, 8.507059e+37 }
 0x210   :  { %v192_v43 = vmul.f32 %v416_v38, %v191_v41 }
 0x212   :  { %v193_v45 = vadd.f32 %v416_v38, %v192_v43 }
 0x213   :  { %v418_v46 = vpop.eup %417 }
 0x214   :  { %v197_v48 = vsel %vm196_vm6, %v416_v38, %v193_v45  ;;  %v204_v49 = vmul.f32 %v418_v46, %v188_v40  ;;  %vm209_vm8 = vweird.f32 %v418_v46 }
 0x215   :  { %v202_v50 = vsel %vm199_vm7, %v201_v47, %v197_v48  ;;  %vm210_vm10 = vmor %vm208_vm9, %vm209_vm8 }
 0x216   :  { %v205_v51 = vsub.f32 1.0, %v204_v49  ;;  %v217_v52 = vmul.f32 %v412_v30, %v202_v50 }
 0x218   :  { %v206_v54 = vmul.f32 %v418_v46, %v205_v51  ;;  %399 = vmatmul.msk.f32.vlgmr.msra.gmra.mxu3 %vm170_vm3, %v217_v52 }
 0x21a   :  { %v207_v56 = vadd.f32 %v418_v46, %v206_v54 }
 0x21c   :  { %v211_v58 = vsel %vm210_vm10, %v418_v46, %v207_v56 }
 0x21d   :  { %v216_v59 = vsel %vm213_vm11, %v215_v57, %v211_v58 }
 0x21e   :  { %v218_v60 = vmul.f32 %v414_v33, %v216_v59 }
 0x220   :  { %400 = vmatmul.msk.f32.vlgmr.msrb.gmra.mxu0 %vm170_vm3, %v218_v60  ;;  %vm357_vm3 = vcmask 916480  }
 0x29b   :  { %v239_v2 = vpop.f32.mrf.mxu3 }
 0x29c   :  { %v265_v3 = vrot.slane %v239_v2, 4  ;;  %v271_v4 = vperm.slane %v239_v2, %v270_v63 }
 0x29d   :  { %v262_v5 = vpop.f32.mrf.mxu0 }
 0x29e   :  { %v288_v7 = vrot.slane %v271_v4, 4  ;;  %v276_v8 = vrot.slane %v262_v5, 4  ;;  %v281_v9 = vperm.slane %v262_v5, %v270_v63  ;;  %v267_v10 = vsel %vm266_vm12, 0.0, %v265_v3 }
 0x29f   :  { %v275_v17 = vperm.slane %v267_v10, %v270_v63 }
 0x2a0   :  { %v277_v11 = vsel %vm266_vm12, 0.0, %v276_v8  ;;  %v286_v12 = vrot.slane %v281_v9, 4  ;;  %v289_v13 = vsel %vm266_vm12, %v281_v9, %v288_v7 }
 0x2a1   :  { %v285_v14 = vperm.slane %v277_v11, %v270_v63  ;;  %v297_v15 = vperm.slane %v289_v13, %v292_v6  ;;  %v300_v25 = vrot.slane %v275_v17, 4 }
 0x2a2   :  { %v287_v16 = vsel %vm266_vm12, %v286_v12, %v271_v4 }
 0x2a3   :  { %v298_v18 = vrot.slane %v285_v14, 4  ;;  %323 = vrot.lane.b32.xlu2 %v297_v15, %s447_s1  ;;  %v312_v19 = vrot.slane %v297_v15, 4  ;;  %v293_v20 = vperm.slane %v287_v16, %v292_v6  ;;  %v301_v27 = vsel %vm266_vm12, %v285_v14, %v300_v25 }
 0x2a4   :  { %v309_v28 = vperm.slane %v301_v27, %v292_v6 }
 0x2a5   :  { %v313_v21 = vsel %vm266_vm12, 0.0, %v312_v19  ;;  %v299_v22 = vsel %vm266_vm12, %v298_v18, %v275_v17  ;;  %v310_v24 = vrot.slane %v293_v20, 4 }
 0x2a6   :  { %327 = vrot.lane.b32.xlu0 %v313_v21, %s448_s14  ;;  %v305_v23 = vperm.slane %v299_v22, %v292_v6  ;;  %v316_v31 = vrot.slane %v309_v28, 4 }
 0x2a7   :  { %v311_v26 = vsel %vm266_vm12, 0.0, %v310_v24 }
 0x2a8   :  { %331 = vrot.lane.b32.xlu1 %v305_v23, %s449_s15  ;;  %v314_v29 = vrot.slane %v305_v23, 4  ;;  %v317_v32 = vsel %vm266_vm12, 0.0, %v316_v31 }
 0x2aa   :  { %v315_v30 = vsel %vm266_vm12, 0.0, %v314_v29 }
 0x2ab   :  { %319 = vrot.lane.b32.xlu2 %v311_v26, %s450_s16 }
 0x2b3   :  { %339 = vrot.lane.b32.xlu2 %v309_v28, %s451_s17 }
 0x2bb   :  { %335 = vrot.lane.b32.xlu2 %v315_v30, %s452_s18 }
 0x2c3   :  { %343 = vrot.lane.b32.xlu2 %v317_v32, %s453_s19 }
 0x2fd   :  { %v324_v33 = vpop.permute.xlu2 %323 }
 0x305   :  { %v320_v34 = vpop.permute.xlu2 %319 }
 0x306   :  { %v346_v36 = vsel %vm117_vm2, %v293_v20, %v320_v34 }
 0x307   :  { %v348_v39 = vsel %vm347_vm13, %v346_v36, %v324_v33 }
 0x30d   :  { %v340_v35 = vpop.permute.xlu2 %339 }
 0x315   :  { %v336_v37 = vpop.permute.xlu2 %335 }
 0x318   :  { %v328_v38 = vpop.permute.xlu0 %327 }
 0x319   :  { %v350_v40 = vsel %vm349_vm14, %v348_v39, %v328_v38 }
 0x31a   :  { %v332_v41 = vpop.permute.xlu1 %331 }
 0x31b   :  { %v352_v42 = vsel %vm351_vm15, %v350_v40, %v332_v41 }
 0x31c   :  { %v354_v43 = vsel %vm353_vm0, %v352_v42, %v336_v37 }
 0x31d   :  { %v356_v44 = vsel %vm355_vm1, %v354_v43, %v340_v35  ;;  %v344_v45 = vpop.permute.xlu2 %343 }
 0x31e   :  { %v358_v46 = vsel %vm357_vm3, %v356_v44, %v344_v45 }
 0x31f   :  { %359 = vst [vmem:[#allocation2] sm:$0x3] %v358_v46 }
 0x320   :  { %370 = dma.vmem_to_hbm [thread:$0]  %s366_s21, 32, %s368_s24, [#allocation3]  }
 0x321   :  { %443 = dma.done.wait [#allocation3], 32  }
 0x322   :  { %444 = vsyncadd [#allocation3], 4294967264 }
 0x323   :  { %375 = vsyncpa [#allocation3], 1 }

</bundles_post_ra>
